<compile_context>
chip_gen: v7x
topology: tpu7x:2x2x1
jax: 0.10.0
libtpu: 0.0.40
codegen_flags: <defaults>
</compile_context>

<pallas_src>
import functools

import jax
import jax.numpy as jnp
from jax.experimental import pallas as pl
from jax.experimental.pallas import tpu as pltpu


def bert_attention_kernel(x_ref, mask_ref,
                          wqkv_ref, bqkv_ref, wo_ref, bo_ref,
                          gamma_ref, beta_ref,
                          out_ref,
                          q_scr, k_scr, v_scr,
                          *, num_heads, head_size, eps, softmax_dtype):
    S = x_ref.shape[1]
    tq = out_ref.shape[1]
    A = num_heads * head_size
    qi = pl.program_id(1)

    # --- fused QKV projection, once per batch element (query-tile 0) -------------------
    @pl.when(qi == 0)
    def _():
        x_b = x_ref[0].astype(jnp.bfloat16)                               # (S, H)
        # 1/sqrt(head_size) is already folded into the Q columns of wqkv / bqkv.
        qkv = jnp.dot(x_b, wqkv_ref[...],
                      preferred_element_type=jnp.float32) + bqkv_ref[...]  # (S, 3A) f32
        qkv_b = qkv.astype(jnp.bfloat16)                                   # cast BEFORE relayout
        q_scr[...] = jnp.transpose(
            qkv_b[:, :A].reshape(S, num_heads, head_size), (1, 0, 2))      # (nh, S, dh)
        k_scr[...] = jnp.transpose(
            qkv_b[:, A:2 * A].reshape(S, num_heads, head_size), (1, 0, 2))
        v_scr[...] = jnp.transpose(
            qkv_b[:, 2 * A:].reshape(S, num_heads, head_size), (1, 0, 2))

    # --- attention for this query tile --------------------------------------------------
    row0 = pl.multiple_of(qi * tq, tq)
    q_t = q_scr[:, pl.ds(row0, tq), :]                                     # (nh, tq, dh) bf16
    mask = mask_ref[0].astype(jnp.float32)                                 # (1, S)

    s = jnp.einsum("nqd,nkd->nqk", q_t, k_scr[...],
                   preferred_element_type=jnp.float32)                     # (nh, tq, S) f32
    s = s + mask[None]                                                     # key-padding bias

    m = jnp.max(s, axis=-1, keepdims=True)                                 # f32 row max
    p = jnp.exp((s - m).astype(softmax_dtype))                             # bf16 on v6e/v7x
    l = jnp.sum(p, axis=-1, keepdims=True, dtype=jnp.float32)              # (nh, tq, 1) f32

    ctx = jnp.einsum("nqk,nkd->nqd", p.astype(jnp.bfloat16), v_scr[...],
                     preferred_element_type=jnp.float32)                   # (nh, tq, dh) f32
    ctx = ctx * pl.reciprocal(l, approx=True)                              # deferred softmax norm
    ctx2 = jnp.transpose(ctx.astype(jnp.bfloat16), (1, 0, 2)).reshape(tq, A)

    # --- output projection + residual + LayerNorm (stats in f32) -----------------------
    o = jnp.dot(ctx2, wo_ref[...], preferred_element_type=jnp.float32) + bo_ref[...]
    x_rows = x_ref[0, pl.ds(row0, tq), :].astype(jnp.float32)              # residual rows
    y = o + x_rows
    mu = jnp.mean(y, axis=-1, keepdims=True)
    var = jnp.mean((y - mu) ** 2, axis=-1, keepdims=True)
    yn = (y - mu) * jax.lax.rsqrt(var + eps)
    out_ref[0] = (yn * gamma_ref[...] + beta_ref[...]).astype(out_ref.dtype)


def _pick_q_tile(seq_len):
    # Flash-style query tiling; falls back to the full sequence for small/odd lengths.
    for t in (256, 128, 64):
        if seq_len % t == 0:
            return t
    return seq_len


def _softmax_dtype():
    # v6e/v7x have bf16 VPU/EUP; v5e would emulate bf16 elementwise (keep f32 there).
    try:
        kind = jax.devices()[0].device_kind.lower()
    except Exception:
        return jnp.float32
    return jnp.bfloat16 if ("v6" in kind or "v7" in kind) else jnp.float32


def _vmem_limit_bytes():
    # Generation-aware scoped-VMEM limit: v7x has 64 MiB physical, v5e/v6e 128 MiB.
    try:
        cap = pltpu.get_tpu_info().vmem_capacity_bytes
    except Exception:
        return 40 * 1024 * 1024
    return 40 * 1024 * 1024 if cap <= 64 * 1024 * 1024 else 100 * 1024 * 1024


def bert_attention(x, mask, params, *, num_heads, head_size, eps=1e-12):
    B, S, H = x.shape
    A = params["wq"].shape[0]  # attention_dim
    assert A == num_heads * head_size

    # One-time (XLA-side) weight repacking: transpose PyTorch (out,in) -> (in,out), fold
    # the 1/sqrt(head_size) scale into the Q columns/bias, fuse Q/K/V into one (H, 3A)
    # bf16 matrix, pre-transpose the output dense weight.
    scale = 1.0 / (float(head_size) ** 0.5)
    wqkv = jnp.concatenate(
        [(params["wq"] * scale).T, params["wk"].T, params["wv"].T],
        axis=1).astype(jnp.bfloat16)                                       # (H, 3A)
    bqkv = jnp.concatenate(
        [params["bq"] * scale, params["bk"], params["bv"]], axis=1)        # (1, 3A) f32
    wo_t = params["wo"].T.astype(jnp.bfloat16)                             # (A, H)

    tq = _pick_q_tile(S)
    n_qt = S // tq

    kernel = functools.partial(
        bert_attention_kernel, num_heads=num_heads, head_size=head_size,
        eps=eps, softmax_dtype=_softmax_dtype())

    def rep(shape):  # replicated (untiled) parameter block, constant index_map
        return pl.BlockSpec(shape, lambda b, qi: tuple(0 for _ in shape))

    return pl.pallas_call(
        kernel,
        out_shape=jax.ShapeDtypeStruct((B, S, H), x.dtype),
        grid=(B, n_qt),
        in_specs=[
            pl.BlockSpec((1, S, H), lambda b, qi: (b, 0, 0)),   # hidden_states (full seq)
            pl.BlockSpec((1, 1, S), lambda b, qi: (b, 0, 0)),   # additive key mask (B,1,S)
            rep((H, 3 * A)), rep((1, 3 * A)),                   # fused QKV weight (bf16), bias
            rep((A, H)), rep((1, H)),                           # output dense weight (bf16), bias
            rep((1, H)), rep((1, H)),                           # LayerNorm gamma, beta
        ],
        out_specs=pl.BlockSpec((1, tq, H), lambda b, qi: (b, qi, 0)),
        scratch_shapes=[
            pltpu.VMEM((num_heads, S, head_size), jnp.bfloat16),  # Q (pre-scaled)
            pltpu.VMEM((num_heads, S, head_size), jnp.bfloat16),  # K
            pltpu.VMEM((num_heads, S, head_size), jnp.bfloat16),  # V
        ],
        compiler_params=pltpu.CompilerParams(
            # batch axis is independent ("parallel", feeds both v7x TensorCores); the
            # query-tile axis reuses per-batch Q/K/V scratch computed at qi==0 -> "arbitrary".
            dimension_semantics=("parallel", "arbitrary"),
            vmem_limit_bytes=_vmem_limit_bytes()),
    )(x, mask, wqkv, bqkv, wo_t, params["bo"], params["gamma"], params["beta"])


def reference_bert_attention(x, mask, params, *, num_heads, head_size, eps=1e-12):
    """Pure-JAX f32 reference matching the PyTorch module (eval mode), (B,1,S) mask."""
    B, S, H = x.shape
    A = params["wq"].shape[0]
    q = x @ params["wq"].T + params["bq"][0]
    k = x @ params["wk"].T + params["bk"][0]
    v = x @ params["wv"].T + params["bv"][0]

    def split(t):  # (B,S,A) -> (B,heads,S,dh)
        return t.reshape(B, S, num_heads, head_size).transpose(0, 2, 1, 3)

    qh, kh, vh = split(q), split(k), split(v)
    scores = jnp.einsum("bhqd,bhkd->bhqk", qh, kh) / (head_size ** 0.5)
    scores = scores + mask[:, None, :, :]            # (B,1,S) -> (B,1,1,S)
    probs = jax.nn.softmax(scores, axis=-1)
    ctx = jnp.einsum("bhqk,bhkd->bhqd", probs, vh)
    ctx = ctx.transpose(0, 2, 1, 3).reshape(B, S, A)
    o = ctx @ params["wo"].T + params["bo"][0]
    y = o + x
    mu = jnp.mean(y, axis=-1, keepdims=True)
    var = jnp.mean((y - mu) ** 2, axis=-1, keepdims=True)
    return (y - mu) * jax.lax.rsqrt(var + eps) * params["gamma"][0] + params["beta"][0]


if __name__ == "__main__":
    # Config: hidden_size=32, num_attention_heads=4 -> head_size=8, attention_dim=32.
    B, S, H = 2, 8, 32
    attention_dim = 32
    head_size = H // 4
    num_heads = attention_dim // head_size

    key = jax.random.PRNGKey(0)
    ks = jax.random.split(key, 12)

    def init_w(k, shape, scale=0.05):
        return (scale * jax.random.normal(k, shape)).astype(jnp.float32)

    params = {
        "wq": init_w(ks[0], (attention_dim, H)), "bq": init_w(ks[1], (1, attention_dim)),
        "wk": init_w(ks[2], (attention_dim, H)), "bk": init_w(ks[3], (1, attention_dim)),
        "wv": init_w(ks[4], (attention_dim, H)), "bv": init_w(ks[5], (1, attention_dim)),
        "wo": init_w(ks[6], (H, attention_dim)), "bo": init_w(ks[7], (1, H)),
        "gamma": jnp.ones((1, H), jnp.float32),
        "beta": jnp.zeros((1, H), jnp.float32),
    }

    x = jax.random.normal(ks[8], (B, S, H), dtype=jnp.float32)
    # Additive key-padding mask (B,1,S): mask out the last 2 key positions of batch element 1.
    mask = jnp.zeros((B, 1, S), jnp.float32)
    mask = mask.at[1, :, S - 2:].set(-10000.0)

    out = bert_attention(x, mask, params, num_heads=num_heads, head_size=head_size)
    out = jax.block_until_ready(out)

    ref = reference_bert_attention(x, mask, params,
                                   num_heads=num_heads, head_size=head_size)
    # Kernel uses bf16 MXU operands (f32 accumulation) + approx reciprocal ->
    # compare at bf16-level tolerance.
    assert jnp.allclose(out, ref, atol=1e-2, rtol=1e-2), "mismatch vs reference"

    print("KERNEL_OK")
</pallas_src>

<mosaic_0001>
module attributes {stable_mosaic.version = 11 : i64} {
  func.func @bert_attention_kernel(%arg0: i32, %arg1: i32, %arg2: memref<1x8x32xf32, #tpu.memory_space<vmem>>, %arg3: memref<1x1x8xf32, #tpu.memory_space<vmem>>, %arg4: memref<32x96xbf16, #tpu.memory_space<vmem>>, %arg5: memref<1x96xf32, #tpu.memory_space<vmem>>, %arg6: memref<32x32xbf16, #tpu.memory_space<vmem>>, %arg7: memref<1x32xf32, #tpu.memory_space<vmem>>, %arg8: memref<1x32xf32, #tpu.memory_space<vmem>>, %arg9: memref<1x32xf32, #tpu.memory_space<vmem>>, %arg10: memref<1x8x32xf32, #tpu.memory_space<vmem>>, %arg11: memref<4x8x8xbf16, #tpu.memory_space<vmem>>, %arg12: memref<4x8x8xbf16, #tpu.memory_space<vmem>>, %arg13: memref<4x8x8xbf16, #tpu.memory_space<vmem>>) attributes {dimension_semantics = [#tpu.dimension_semantics<parallel>, #tpu.dimension_semantics<arbitrary>], iteration_bounds = array<i64: 2, 1>, scalar_prefetch = 0 : i64, scratch_operands = 3 : i64, tpu.core_type = #tpu.core_type<tc>, window_params = [{transform_indices = @transform_0, window_bounds = array<i64: 1, 8, 32>}, {transform_indices = @transform_1, window_bounds = array<i64: 1, 1, 8>}, {pipeline_mode = #tpu.pipeline_mode<synchronous>, transform_indices = @transform_2, window_bounds = array<i64: 32, 96>}, {pipeline_mode = #tpu.pipeline_mode<synchronous>, transform_indices = @transform_3, window_bounds = array<i64: 1, 96>}, {pipeline_mode = #tpu.pipeline_mode<synchronous>, transform_indices = @transform_4, window_bounds = array<i64: 32, 32>}, {pipeline_mode = #tpu.pipeline_mode<synchronous>, transform_indices = @transform_5, window_bounds = array<i64: 1, 32>}, {pipeline_mode = #tpu.pipeline_mode<synchronous>, transform_indices = @transform_6, window_bounds = array<i64: 1, 32>}, {pipeline_mode = #tpu.pipeline_mode<synchronous>, transform_indices = @transform_7, window_bounds = array<i64: 1, 32>}, {transform_indices = @transform_8, window_bounds = array<i64: 1, 8, 32>}]} {
    %c0_i32 = arith.constant 0 : i32
    %0 = arith.cmpi eq, %arg1, %c0_i32 : i32
    %1 = arith.extui %0 : i1 to i32
    %c0_i32_0 = arith.constant 0 : i32
    %2 = arith.cmpi ne, %1, %c0_i32_0 : i32
    scf.if %2 {
      %c0_33 = arith.constant 0 : index
      %c0_34 = arith.constant 0 : index
      %c0_35 = arith.constant 0 : index
      %66 = vector.load %arg2[%c0_33, %c0_34, %c0_35] : memref<1x8x32xf32, #tpu.memory_space<vmem>>, vector<1x8x32xf32>
      %67 = vector.shape_cast %66 : vector<1x8x32xf32> to vector<8x32xf32>
      %68 = arith.truncf %67 : vector<8x32xf32> to vector<8x32xbf16>
      %c0_36 = arith.constant 0 : index
      %c0_37 = arith.constant 0 : index
      %69 = vector.load %arg4[%c0_36, %c0_37] : memref<32x96xbf16, #tpu.memory_space<vmem>>, vector<32x96xbf16>
      %cst_38 = arith.constant dense<0.000000e+00> : vector<8x96xf32>
      %70 = tpu.matmul %68, %69, %cst_38 {dimension_numbers = #tpu.dot_dimension_numbers<[1], [0], [0], [1], [0, 0, 1, 1], [], []>} : vector<8x32xbf16>, vector<32x96xbf16>, vector<8x96xf32> -> vector<8x96xf32>
      %c0_39 = arith.constant 0 : index
      %c0_40 = arith.constant 0 : index
      %71 = vector.load %arg5[%c0_39, %c0_40] : memref<1x96xf32, #tpu.memory_space<vmem>>, vector<1x96xf32>
      %72 = vector.broadcast %71 : vector<1x96xf32> to vector<8x96xf32>
      %73 = arith.addf %70, %72 : vector<8x96xf32>
      %74 = arith.truncf %73 : vector<8x96xf32> to vector<8x96xbf16>
      %75 = vector.extract_strided_slice %74 {offsets = [0, 0], sizes = [8, 32], strides = [1, 1]} : vector<8x96xbf16> to vector<8x32xbf16>
      %76 = vector.shape_cast %75 : vector<8x32xbf16> to vector<8x4x8xbf16>
      %77 = tpu.transpose %76, [1, 0, 2] : vector<8x4x8xbf16> -> vector<4x8x8xbf16>
      %c0_41 = arith.constant 0 : index
      %c0_42 = arith.constant 0 : index
      %c0_43 = arith.constant 0 : index
      %78 = vector.load %arg11[%c0_41, %c0_42, %c0_43] : memref<4x8x8xbf16, #tpu.memory_space<vmem>>, vector<4x8x8xbf16>
      tpu.vector_store %arg11[%c0_41, %c0_42, %c0_43], %77 {strides = array<i32>} : memref<4x8x8xbf16, #tpu.memory_space<vmem>>, vector<4x8x8xbf16>,
      %79 = vector.extract_strided_slice %74 {offsets = [0, 32], sizes = [8, 32], strides = [1, 1]} : vector<8x96xbf16> to vector<8x32xbf16>
      %80 = vector.shape_cast %79 : vector<8x32xbf16> to vector<8x4x8xbf16>
      %81 = tpu.transpose %80, [1, 0, 2] : vector<8x4x8xbf16> -> vector<4x8x8xbf16>
      %c0_44 = arith.constant 0 : index
      %c0_45 = arith.constant 0 : index
      %c0_46 = arith.constant 0 : index
      %82 = vector.load %arg12[%c0_44, %c0_45, %c0_46] : memref<4x8x8xbf16, #tpu.memory_space<vmem>>, vector<4x8x8xbf16>
      tpu.vector_store %arg12[%c0_44, %c0_45, %c0_46], %81 {strides = array<i32>} : memref<4x8x8xbf16, #tpu.memory_space<vmem>>, vector<4x8x8xbf16>,
      %83 = vector.extract_strided_slice %74 {offsets = [0, 64], sizes = [8, 32], strides = [1, 1]} : vector<8x96xbf16> to vector<8x32xbf16>
      %84 = vector.shape_cast %83 : vector<8x32xbf16> to vector<8x4x8xbf16>
      %85 = tpu.transpose %84, [1, 0, 2] : vector<8x4x8xbf16> -> vector<4x8x8xbf16>
      %c0_47 = arith.constant 0 : index
      %c0_48 = arith.constant 0 : index
      %c0_49 = arith.constant 0 : index
      %86 = vector.load %arg13[%c0_47, %c0_48, %c0_49] : memref<4x8x8xbf16, #tpu.memory_space<vmem>>, vector<4x8x8xbf16>
      tpu.vector_store %arg13[%c0_47, %c0_48, %c0_49], %85 {strides = array<i32>} : memref<4x8x8xbf16, #tpu.memory_space<vmem>>, vector<4x8x8xbf16>,
    } else {
    }
    %c8_i32 = arith.constant 8 : i32
    %3 = arith.muli %arg1, %c8_i32 : i32
    %4 = tpu.assume_multiple %3, 8 : i32
    %c0 = arith.constant 0 : index
    %5 = arith.index_cast %4 : i32 to index
    %c0_1 = arith.constant 0 : index
    %6 = vector.load %arg11[%c0, %5, %c0_1] : memref<4x8x8xbf16, #tpu.memory_space<vmem>>, vector<4x8x8xbf16>
    %c0_2 = arith.constant 0 : index
    %c0_3 = arith.constant 0 : index
    %c0_4 = arith.constant 0 : index
    %7 = vector.load %arg3[%c0_2, %c0_3, %c0_4] : memref<1x1x8xf32, #tpu.memory_space<vmem>>, vector<1x1x8xf32>
    %8 = vector.shape_cast %7 : vector<1x1x8xf32> to vector<1x8xf32>
    %c0_5 = arith.constant 0 : index
    %c0_6 = arith.constant 0 : index
    %c0_7 = arith.constant 0 : index
    %9 = vector.load %arg12[%c0_5, %c0_6, %c0_7] : memref<4x8x8xbf16, #tpu.memory_space<vmem>>, vector<4x8x8xbf16>
    "tpu.trace_start"() <{level = 10 : i32, message = "nqd,nkd->nqk"}> : () -> ()
    %cst = arith.constant dense<0.000000e+00> : vector<4x8x8xf32>
    %10 = tpu.matmul %6, %9, %cst {dimension_numbers = #tpu.dot_dimension_numbers<[2], [2], [1], [1], [0, 0, 0, 1, 1, 1], [0], [0]>} : vector<4x8x8xbf16>, vector<4x8x8xbf16>, vector<4x8x8xf32> -> vector<4x8x8xf32>
    "tpu.trace_stop"() : () -> ()
    %11 = vector.shape_cast %8 : vector<1x8xf32> to vector<1x1x8xf32>
    %12 = vector.broadcast %11 : vector<1x1x8xf32> to vector<4x8x8xf32>
    %13 = arith.addf %10, %12 : vector<4x8x8xf32>
    %cst_8 = arith.constant dense<0xFF800000> : vector<4x8xf32>
    %14 = vector.multi_reduction <maximumf>, %13, %cst_8 [2] : vector<4x8x8xf32> to vector<4x8xf32>
    %15 = vector.shape_cast %14 : vector<4x8xf32> to vector<4x8x1xf32>
    %16 = vector.broadcast %15 : vector<4x8x1xf32> to vector<4x8x8xf32>
    %17 = arith.subf %13, %16 : vector<4x8x8xf32>
    %18 = math.exp %17 : vector<4x8x8xf32>
    %cst_9 = arith.constant dense<0.000000e+00> : vector<4x8xf32>
    %19 = vector.multi_reduction <add>, %18, %cst_9 [2] : vector<4x8x8xf32> to vector<4x8xf32>
    %20 = vector.shape_cast %19 : vector<4x8xf32> to vector<4x8x1xf32>
    %21 = arith.truncf %18 : vector<4x8x8xf32> to vector<4x8x8xbf16>
    %c0_10 = arith.constant 0 : index
    %c0_11 = arith.constant 0 : index
    %c0_12 = arith.constant 0 : index
    %22 = vector.load %arg13[%c0_10, %c0_11, %c0_12] : memref<4x8x8xbf16, #tpu.memory_space<vmem>>, vector<4x8x8xbf16>
    "tpu.trace_start"() <{level = 10 : i32, message = "nqk,nkd->nqd"}> : () -> ()
    %cst_13 = arith.constant dense<0.000000e+00> : vector<4x8x8xf32>
    %23 = tpu.matmul %21, %22, %cst_13 {dimension_numbers = #tpu.dot_dimension_numbers<[2], [1], [1], [2], [0, 0, 0, 1, 1, 2], [0], [0]>} : vector<4x8x8xbf16>, vector<4x8x8xbf16>, vector<4x8x8xf32> -> vector<4x8x8xf32>
    "tpu.trace_stop"() : () -> ()
    %24 = tpu.reciprocal %20 {approx = true} : vector<4x8x1xf32> -> vector<4x8x1xf32>
    %25 = vector.broadcast %24 : vector<4x8x1xf32> to vector<4x8x8xf32>
    %26 = arith.mulf %23, %25 : vector<4x8x8xf32>
    %27 = arith.truncf %26 : vector<4x8x8xf32> to vector<4x8x8xbf16>
    %28 = tpu.transpose %27, [1, 0, 2] : vector<4x8x8xbf16> -> vector<8x4x8xbf16>
    %29 = vector.shape_cast %28 : vector<8x4x8xbf16> to vector<8x32xbf16>
    %c0_14 = arith.constant 0 : index
    %c0_15 = arith.constant 0 : index
    %30 = vector.load %arg6[%c0_14, %c0_15] : memref<32x32xbf16, #tpu.memory_space<vmem>>, vector<32x32xbf16>
    %cst_16 = arith.constant dense<0.000000e+00> : vector<8x32xf32>
    %31 = tpu.matmul %29, %30, %cst_16 {dimension_numbers = #tpu.dot_dimension_numbers<[1], [0], [0], [1], [0, 0, 1, 1], [], []>} : vector<8x32xbf16>, vector<32x32xbf16>, vector<8x32xf32> -> vector<8x32xf32>
    %c0_17 = arith.constant 0 : index
    %c0_18 = arith.constant 0 : index
    %32 = vector.load %arg7[%c0_17, %c0_18] : memref<1x32xf32, #tpu.memory_space<vmem>>, vector<1x32xf32>
    %33 = vector.broadcast %32 : vector<1x32xf32> to vector<8x32xf32>
    %34 = arith.addf %31, %33 : vector<8x32xf32>
    %c0_19 = arith.constant 0 : index
    %35 = arith.index_cast %4 : i32 to index
    %c0_20 = arith.constant 0 : index
    %36 = vector.load %arg2[%c0_19, %35, %c0_20] : memref<1x8x32xf32, #tpu.memory_space<vmem>>, vector<1x8x32xf32>
    %37 = vector.shape_cast %36 : vector<1x8x32xf32> to vector<8x32xf32>
    %38 = arith.addf %34, %37 : vector<8x32xf32>
    %cst_21 = arith.constant dense<0.000000e+00> : vector<8xf32>
    %39 = vector.multi_reduction <add>, %38, %cst_21 [1] : vector<8x32xf32> to vector<8xf32>
    %40 = vector.shape_cast %39 : vector<8xf32> to vector<8x1xf32>
    %cst_22 = arith.constant 3.200000e+01 : f32
    %41 = vector.broadcast %cst_22 : f32 to vector<8x1xf32>
    %42 = arith.divf %40, %41 : vector<8x1xf32>
    %43 = vector.broadcast %42 : vector<8x1xf32> to vector<8x32xf32>
    %44 = arith.subf %38, %43 : vector<8x32xf32>
    %45 = arith.mulf %44, %44 : vector<8x32xf32>
    %cst_23 = arith.constant dense<0.000000e+00> : vector<8xf32>
    %46 = vector.multi_reduction <add>, %45, %cst_23 [1] : vector<8x32xf32> to vector<8xf32>
    %47 = vector.shape_cast %46 : vector<8xf32> to vector<8x1xf32>
    %cst_24 = arith.constant 3.200000e+01 : f32
    %48 = vector.broadcast %cst_24 : f32 to vector<8x1xf32>
    %49 = arith.divf %47, %48 : vector<8x1xf32>
    %50 = vector.broadcast %42 : vector<8x1xf32> to vector<8x32xf32>
    %51 = arith.subf %38, %50 : vector<8x32xf32>
    %cst_25 = arith.constant 9.99999996E-13 : f32
    %52 = vector.broadcast %cst_25 : f32 to vector<8x1xf32>
    %53 = arith.addf %49, %52 : vector<8x1xf32>
    %54 = math.rsqrt %53 : vector<8x1xf32>
    %55 = vector.broadcast %54 : vector<8x1xf32> to vector<8x32xf32>
    %56 = arith.mulf %51, %55 : vector<8x32xf32>
    %c0_26 = arith.constant 0 : index
    %c0_27 = arith.constant 0 : index
    %57 = vector.load %arg8[%c0_26, %c0_27] : memref<1x32xf32, #tpu.memory_space<vmem>>, vector<1x32xf32>
    %58 = vector.broadcast %57 : vector<1x32xf32> to vector<8x32xf32>
    %59 = arith.mulf %56, %58 : vector<8x32xf32>
    %c0_28 = arith.constant 0 : index
    %c0_29 = arith.constant 0 : index
    %60 = vector.load %arg9[%c0_28, %c0_29] : memref<1x32xf32, #tpu.memory_space<vmem>>, vector<1x32xf32>
    %61 = vector.broadcast %60 : vector<1x32xf32> to vector<8x32xf32>
    %62 = arith.addf %59, %61 : vector<8x32xf32>
    %c0_30 = arith.constant 0 : index
    %c0_31 = arith.constant 0 : index
    %c0_32 = arith.constant 0 : index
    %63 = vector.load %arg10[%c0_30, %c0_31, %c0_32] : memref<1x8x32xf32, #tpu.memory_space<vmem>>, vector<1x8x32xf32>
    %64 = vector.shape_cast %63 : vector<1x8x32xf32> to vector<8x32xf32>
    %65 = vector.shape_cast %62 : vector<8x32xf32> to vector<1x8x32xf32>
    tpu.vector_store %arg10[%c0_30, %c0_31, %c0_32], %65 {strides = array<i32>} : memref<1x8x32xf32, #tpu.memory_space<vmem>>, vector<1x8x32xf32>,
    return
  }
  func.func @transform_0(%arg0: i32, %arg1: i32) -> (i32, i32, i32) {
    %c0_i32 = arith.constant 0 : i32
    %c0_i32_0 = arith.constant 0 : i32
    %c0_i32_1 = arith.constant 0 : i32
    return %arg0, %c0_i32, %c0_i32_0 : i32, i32, i32
  }
  func.func @transform_1(%arg0: i32, %arg1: i32) -> (i32, i32, i32) {
    %c0_i32 = arith.constant 0 : i32
    %c0_i32_0 = arith.constant 0 : i32
    %c0_i32_1 = arith.constant 0 : i32
    return %arg0, %c0_i32, %c0_i32_0 : i32, i32, i32
  }
  func.func @transform_2(%arg0: i32, %arg1: i32) -> (i32, i32) {
    %c0_i32 = arith.constant 0 : i32
    %c0_i32_0 = arith.constant 0 : i32
    %c0_i32_1 = arith.constant 0 : i32
    return %c0_i32, %c0_i32_0 : i32, i32
  }
  func.func @transform_3(%arg0: i32, %arg1: i32) -> (i32, i32) {
    %c0_i32 = arith.constant 0 : i32
    %c0_i32_0 = arith.constant 0 : i32
    %c0_i32_1 = arith.constant 0 : i32
    return %c0_i32, %c0_i32_0 : i32, i32
  }
  func.func @transform_4(%arg0: i32, %arg1: i32) -> (i32, i32) {
    %c0_i32 = arith.constant 0 : i32
    %c0_i32_0 = arith.constant 0 : i32
    %c0_i32_1 = arith.constant 0 : i32
    return %c0_i32, %c0_i32_0 : i32, i32
  }
  func.func @transform_5(%arg0: i32, %arg1: i32) -> (i32, i32) {
    %c0_i32 = arith.constant 0 : i32
    %c0_i32_0 = arith.constant 0 : i32
    %c0_i32_1 = arith.constant 0 : i32
    return %c0_i32, %c0_i32_0 : i32, i32
  }
  func.func @transform_6(%arg0: i32, %arg1: i32) -> (i32, i32) {
    %c0_i32 = arith.constant 0 : i32
    %c0_i32_0 = arith.constant 0 : i32
    %c0_i32_1 = arith.constant 0 : i32
    return %c0_i32, %c0_i32_0 : i32, i32
  }
  func.func @transform_7(%arg0: i32, %arg1: i32) -> (i32, i32) {
    %c0_i32 = arith.constant 0 : i32
    %c0_i32_0 = arith.constant 0 : i32
    %c0_i32_1 = arith.constant 0 : i32
    return %c0_i32, %c0_i32_0 : i32, i32
  }
  func.func @transform_8(%arg0: i32, %arg1: i32) -> (i32, i32, i32) {
    %c0_i32 = arith.constant 0 : i32
    %c0_i32_0 = arith.constant 0 : i32
    return %arg0, %arg1, %c0_i32 : i32, i32, i32
  }
}

</mosaic_0001>

<bundles_post_ra>
// kernel: tpu_custom_call.1
= control target key start
LH: loop header
LB: loop body
LE: loop exit
PB: predicated region body
PF: predicated region fallthrough
CT: control target
= control target key end

     0   :  { %s2745_s0 = inlined_call_operand.hbm [shape: f32[2,8,32], index: 0, kind: input, shape index: {}]   ;;  %s2746_s1 = inlined_call_operand.vmem [shape: f32[2,1,8], index: 1, kind: input, shape index: {}]   ;;  %s2747_s2 = inlined_call_operand.hbm [shape: bf16[32,96], index: 2, kind: input, shape index: {}]   ;;  %s2748_s3 = inlined_call_operand.vmem [shape: f32[1,96], index: 3, kind: input, shape index: {}]   ;;  %s2749_s4 = inlined_call_operand.hbm [shape: bf16[32,32], index: 4, kind: input, shape index: {}]   ;;  %s2750_s5 = inlined_call_operand.vmem [shape: f32[1,32], index: 5, kind: input, shape index: {}]   ;;  %s2751_s6 = inlined_call_operand.vmem [shape: f32[1,32], index: 6, kind: input, shape index: {}]   ;;  %s2752_s7 = inlined_call_operand.vmem [shape: f32[1,32], index: 7, kind: input, shape index: {}]   ;;  %s2753_s8 = inlined_call_operand.hbm [shape: f32[2,8,32], index: 8, kind: output, shape index: {}]  }
   0x1   :  { %2761 = sst [smem:[#allocation17_spill]] %s2753_s8 }
   0x2   :  { %13 = vsyncpa [#allocation6], 0 }
   0x3   :  { %15 = vsyncpa [#allocation6 + $0x1], 0 }
   0x4   :  { %16 = vsyncpa [#allocation9], 0 }
   0x5   :  { %17 = vsyncpa [#allocation7], 0 }
   0x6   :  { %19 = vsyncpa [#allocation7 + $0x1], 0  ;;  %s2311_s27 = smov 0   ;;  %s2313_s28 = smov 0  }
   0x7   :  { %s2315_s29 = smov 0   ;;  %s2317_s30 = smov 0  }
   0x8   :  { %s2319_s9 = smov 0   ;;  %s2321_s10 = smov 0  }
   0x9 LB: > { %2762 = sst [smem:[#allocation15_spill]] %s2225_s27  ;;  %s1831_s11 = sadd.s32 4294967295, %s2245_s10   ;;  %s2245_s10 = sphi %s2321_s10, %s25_s10   ;;  %s2241_s9 = sphi %s2319_s9, %s2784_s9   ;;  %s2237_s30 = sphi %s2317_s30, %s2783_s30   ;;  %s2233_s29 = sphi %s2315_s29, %s2782_s29   ;;  %s2229_s28 = sphi %s2313_s28, %s2781_s28   ;;  %s2225_s27 = sphi %s2311_s27, %s2780_s27  }
   0xa   : > { %s1832_s12 = sadd.s32 4294967294, %s2245_s10   ;;  %p57_p0 = scmp.ne.s32.totalorder %s2229_s28, %s2225_s27 }
   0xb   : > { %p2345_p1 = scmp.eq.s32.totalorder %s1831_s11, 0  ;;  %p2349_p2 = scmp.eq.s32.totalorder %s1831_s11, 1 }
   0xc   : > { %p241_p3 = scmp.eq.s32.totalorder %s1832_s12, 1  ;;  %p1833_p5 = scmp.ge.s32.totalorder %s2245_s10, 1 }
   0xd   : > { %s2763_s13 = scalar_select %p2345_p1, 1, 0 }
   0xe   : > { %p2355_p4 = por %p2345_p1, %p57_p0  ;;  %p2360_p6 = por %p241_p3, %p57_p0 }
   0xf   : > { %p248_p7 = scmp.lt.s32.totalorder %s2245_s10, 3  ;;  %s2247_s18 = smov [#allocation8]  }
  0x10   : > { %s2765_s15 = scalar_select %p2355_p4, 1, 0 }
  0x11   : > { %s2766_s16 = scalar_select %p2360_p6, 1, 0 }
  0x12   : > { %p2365_p8 = pnand %p1833_p5, %p248_p7  ;;  %s260_s19 = sshll.u32 %s2247_s18, 4  ;;  %s2369_s19 = int_to_ptr.vmem [resolvable:$true] %s260_s19 }
  0x13   : > { %2767 = sst [smem:[#allocation16_spill]] %s2766_s16  ;;  %s2248_s21 = smov [#allocation10]  }
  0x14   : > { %p1965_p9 = pneg %p2365_p8  ;;  %s276_s22 = sshll.u32 %s2248_s21, 4  ;;  %s2380_s22 = int_to_ptr.vmem [resolvable:$true] %s276_s22 }
  0x15   : > { %s2073_s25 = scalar_lea.hbm %s2747_s2, 256 }
  0x16   : > { %p2376_p11 = pnand %p1965_p9, %p2345_p1  ;;  %p2074_p12 = scmp.ne.s32.totalorder %s2747_s2, %s2073_s25 }
  0x17   : > { %p2080_p5 = scmp.lt.u32.totalorder %s2073_s25, %s2747_s2 }
  0x18   : > { %p2075_p13 = pneg %p2376_p11 }
  0x1a   : > { %p2076_p0 = pnand %p2075_p13, %p2074_p12 }
  0x1c   : > { %p2077_p3 = pneg %p2076_p0 }
  0x1e   : > { %p2082_p7 = pnand %p2080_p5, %p2077_p3 }
  0x20   : > { %2085 = shalt.err (!%p2082_p7)
}
  0x21   : > { %s2086_s21 = scalar_lea.vmem %s2369_s19, 256  ;;  %p2094_p1 = scmp.lt.s32.totalorder %s2369_s19, %s2369_s19 }
  0x22   : > { %p2087_p9 = scmp.ne.s32.totalorder %s2369_s19, %s2086_s21  ;;  %p2095_p12 = scmp.lt.s32.totalorder %s2086_s21, %s2086_s21 }
  0x24   : > { %p2089_p10 = pnand %p2087_p9, %p2075_p13  ;;  %p2096_p0 = por %p2095_p12, %p2094_p1 }
  0x26   : > { %p2090_p6 = pneg %p2089_p10 }
  0x28   : > { %p2097_p4 = pnand %p2096_p0, %p2090_p6 }
  0x2a   : > { %2100 = shalt.err (!%p2097_p4)
}
  0x2b   : > { %s2249_s23 = smov 64   ;;  %s2250_s24 = smov 4  }
  0x2c   : > { %1968 = dma.hbm_to_vmem [thread:$0]  (!%p2376_p11), %s2747_s2, 256, %s2369_s19, [#allocation9], %s2249_s23, %s2249_s23, %s2250_s24  }
  0x2d   : > { %s2101_s18 = scalar_lea.hbm %s2749_s4, 256 }
  0x2e   : > { %p2102_p1 = scmp.ne.s32.totalorder %s2749_s4, %s2101_s18  ;;  %p2108_p10 = scmp.lt.u32.totalorder %s2101_s18, %s2749_s4 }
  0x30   : > { %p2104_p4 = pnand %p2102_p1, %p2075_p13 }
  0x32   : > { %p2105_p6 = pneg %p2104_p4 }
  0x34   : > { %p2110_p3 = pnand %p2108_p10, %p2105_p6 }
  0x36   : > { %2113 = shalt.err (!%p2110_p3)
}
  0x37   : > { %s2114_s19 = scalar_lea.vmem %s2380_s22, 256  ;;  %p2122_p12 = scmp.lt.s32.totalorder %s2380_s22, %s2380_s22 }
  0x38   : > { %p2115_p5 = scmp.ne.s32.totalorder %s2380_s22, %s2114_s19  ;;  %p2123_p0 = scmp.lt.s32.totalorder %s2114_s19, %s2114_s19 }
  0x3a   : > { %p2117_p7 = pnand %p2115_p5, %p2075_p13  ;;  %p2124_p1 = por %p2123_p0, %p2122_p12 }
  0x3c   : > { %p2118_p9 = pneg %p2117_p7 }
  0x3e   : > { %p2125_p4 = pnand %p2124_p1, %p2118_p9 }
  0x40   : > { %2128 = shalt.err (!%p2125_p4)
}
  0x41   : > { %1971 = dma.hbm_to_vmem [thread:$0]  (!%p2376_p11), %s2749_s4, 256, %s2380_s22, [#allocation9], %s2249_s23, %s2249_s23, %s2250_s24  }
  0x42   : > { %s37_s16 = sadd.s32 1, %s2241_s9  ;;  %s44_s25 = sadd.s32 1, %s2233_s29 }
  0x43   : > { %p39_p13 = scmp.ge.s32.totalorder %s37_s16, 2  ;;  %p51_p6 = scmp.ne.s32.totalorder %s2233_s29, %s2229_s28 }
  0x44   : > { %p52_p10 = scmp.eq.s32.totalorder %s2245_s10, 0  ;;  %p1982_p3 = scmp.lt.s32.totalorder %s2245_s10, 2 }
  0x45   : > { %s2786_s16 = smov (%p39_p13, %s37_s16), 0  ;;  %p2444_p7 = por %p2349_p2, %p51_p6 }
  0x46   : > { %p53_p5 = por %p52_p10, %p51_p6  ;;  %s41_s26 = ssub.s32 %s2241_s9, %s2786_s16 }
  0x47   : > { %s2770_s20 = scalar_select %p2444_p7, 1, 0 }
  0x48   : > { %s299_s11 = sand.u32 1, %s2233_s29   ;;  %p42_p9 = scmp.eq.s32.totalorder %s41_s26, 0 }
  0x49   : > { %s1837_s22 = sshll.u32 %s299_s11, 3  ;;  %s1838_s23 = sshll.u32 %s2241_s9, 7 }
  0x4a   : > { %s2453_s24 = scalar_select %p42_p9, %s2233_s29, %s44_s25  }
  0x4b   : > { %s2458_s21 = scalar_lea.hbm %s2745_s0, %s1838_s23  ;;  %s303_s14 = scalar_lea.vmem [#allocation5], %s1837_s22 }
  0x4c   : > { %s310_s19 = sshll.u32 %s303_s14, 4  ;;  %p2462_p2 = pnand %p1982_p3, %p53_p5  ;;  %s2466_s19 = int_to_ptr.vmem [resolvable:$true] %s310_s19 }
  0x4d   : > { %s300_s27 = scalar_lea.sflag [#allocation6], %s299_s11  ;;  %s2129_s25 = scalar_lea.hbm %s2458_s21, 128 }
  0x4e   : > { %p2130_p11 = scmp.ne.s32.totalorder %s2458_s21, %s2129_s25  ;;  %p2131_p12 = pneg %p2462_p2 }
  0x4f   : > { %s2134_s23 = scalar_lea.hbm %s2745_s0, 256  ;;  %p2135_p4 = scmp.lt.u32.totalorder %s2458_s21, %s2745_s0 }
  0x50   : > { %p2132_p0 = pnand %p2131_p12, %p2130_p11  ;;  %p2136_p13 = scmp.lt.u32.totalorder %s2134_s23, %s2129_s25 }
  0x51   : > { %p2138_p10 = scmp.lt.u32.totalorder %s2129_s25, %s2458_s21 }
  0x52   : > { %p2133_p1 = pneg %p2132_p0  ;;  %p2137_p6 = por %p2136_p13, %p2135_p4 }
  0x54   : > { %p2139_p3 = por %p2138_p10, %p2137_p6 }
  0x56   : > { %p2140_p5 = pnand %p2139_p3, %p2133_p1 }
  0x58   : > { %2143 = shalt.err (!%p2140_p5)
}
  0x59   : > { %s2144_s11 = scalar_lea.vmem %s2466_s19, 128  ;;  %s2251_s14 = smov [#allocation5]  }
  0x5a   : > { %p2145_p9 = scmp.ne.s32.totalorder %s2466_s19, %s2144_s11  ;;  %s2149_s26 = sshll.u32 %s2251_s14, 4  ;;  %s2150_s26 = int_to_ptr.vmem [resolvable:$false] %s2149_s26 }
  0x5b   : > { %s2151_s22 = scalar_lea.vmem %s2150_s26, 256  ;;  %p2152_p7 = scmp.lt.s32.totalorder %s2466_s19, %s2150_s26 }
  0x5c   : > { %p2147_p11 = pnand %p2145_p9, %p2131_p12  ;;  %p2153_p4 = scmp.lt.s32.totalorder %s2151_s22, %s2144_s11 }
  0x5e   : > { %p2148_p0 = pneg %p2147_p11  ;;  %p2154_p13 = por %p2153_p4, %p2152_p7 }
  0x60   : > { %p2155_p6 = pnand %p2154_p13, %p2148_p0 }
  0x62   : > { %2158 = shalt.err (!%p2155_p6)
}
  0x63   : > { %1975 = dma.hbm_to_vmem [thread:$0]  (!%p2462_p2), %s2458_s21, 128, %s2466_s19, %s300_s27  }
  0x64   : > { %325 = sbr.rel (%p2365_p8) target bundleno = 1898 (0x76a), region = 52  ;;  %s2496_s25 = sand.u32 (!%p2365_p8), 1, %s2229_s28  }
  0x65   : > { %s1840_s23 = sshll.u32 (!%p2365_p8), %s2496_s25, 3  ;;  %s328_s12 = scalar_lea.sflag (!%p2365_p8), [#allocation6], %s2496_s25 }
  0x66   : > { %s331_s18 = scalar_lea.vmem (!%p2365_p8), [#allocation5], %s1840_s23  ;;  %p2772_p7 = scmp.ne.s32.totalorder (!%p2365_p8), %s2765_s15, 0 }
  0x6b   : > { %2212 = dma.done.wait (%p2772_p7), %s328_s12, 128  }
  0x6c   : > { %2214 = vsyncadd (%p2772_p7), %s328_s12, 4294967168  ;;  %p2773_p2 = scmp.ne.s32.totalorder %s2763_s13, 0 }
  0x6e   : > { %2216 = dma.done.wait (%p2773_p2), [#allocation9], 512  }
  0x6f   : > { %2218 = vsyncadd (%p2773_p2), [#allocation9], 4294966784  ;;  %v2252_v0 = vmov 0.0   ;;  %vm2253_vm0 = vmmov 0   ;;  %v2051_v1 = vld [vmem:[#allocation8] sm:$0xff]   ;;  %v2052_v2 = vld [vmem:[#allocation8 + $0x8] sm:$0xff]   ;;  %v463_v14 = vlaneseq }
  0x70   : > { %1889 = vmatprep.subr.bf16.mxu0 %v2252_v0  ;;  %1893 = vmatprep.mubr.msk.bf16.mxu0 %vm2253_vm0, %v2252_v0  ;;  %v2516_v3 = vld [vmem:[%s331_s18] sm:$0xff]  ;;  %vm408_vm1 = vcmask 261120   ;;  %v1844_v5 = vld [vmem:[%s2748_s3] ss:$0 sm:$0xff]  ;;  %s2254_s17 = smov 104   ;;  %s2255_s21 = smov 120  }
  0x71   : > { %1897 = vmatprep.subr.bf16.mxu1 %v2252_v0  ;;  %1899 = vmatprep.mubr.msk.bf16.mxu1 %vm2253_vm0, %v2252_v0  ;;  %v384_v4 = vpack.c.bf16 %v2516_v3, %v2516_v3  ;;  %s2256_s19 = smov 96   ;;  %s2257_s8 = smov 112   ;;  %v2258_v12 = vmov 1983009808   ;;  %v2259_v15 = vmov 1934713408  }
  0x72   : > { %1890 = vmatpush3.bf16.msra.mxu0 %v2051_v1  ;;  %v461_v13 = vunpack.c.l.s4 %v2258_v12  ;;  %v478_v16 = vunpack.c.l.s4 %v2259_v15  ;;  %v464_v18 = vshrl.u32 %v463_v14, 7  ;;  %v2260_v35 = vmov 0   ;;  %s2261_s27 = smov 64   ;;  %p375_p8 = scmp.lt.s32.totalorder %s2237_s30, 1 }
  0x73   : > { %1891 = vmatprep.subr.bf16.mxu0 %v2252_v0  ;;  %vm625_vm2 = vcmask 60416   ;;  %vm1006_vm3 = vcmask 64512   ;;  %vm1238_vm4 = vcmask 1043456   ;;  %s2262_s12 = smov 8   ;;  %s2263_s18 = smov 16   ;;  %vm1599_vm5 = vcmask 130048  }
  0x74   : > { %v462_v17 = vunpack.c.0.s8 %v461_v13  ;;  %v479_v19 = vunpack.c.0.s8 %v478_v16  ;;  %s376_s11 = scalar_select %p375_p8, %s2237_s30, 1  ;;  %vm1602_vm6 = vcmask 195584  }
  0x75   : > { %s2264_s13 = smov 24   ;;  %s374_s14 = scalar_lea.vmem [#allocation11], %s1840_s23 }
  0x76   : > { %1892 = vmatpush3.bf16.msra.mxu0 %v2052_v2  ;;  %v2528_v20 = vsub.s32 %v462_v17, %v464_v18  ;;  %v2531_v24 = vsub.s32 %v479_v19, %v464_v18  ;;  %s377_s22 = scalar_lea.vmem %s2746_s1, %s376_s11  ;;  %s1864_s11 = sshll.u32 %s2237_s30, 7 }
  0x77   : > { %1903 = vmatprep.subr.bf16.mxu0 %v2252_v0  ;;  %s1720_s26 = sshll.u32 %s374_s14, 4  ;;  %s1706_s15 = scalar_lea.sflag [#allocation7], %s2496_s25  ;;  %s2697_s26 = int_to_ptr.vmem [resolvable:$true] %s1720_s26 }
  0x78   : > { %p2775_p1 = scmp.ne.s32.totalorder %s2770_s20, 0  ;;  %s2265_s30 = smov [#allocation11]  }
  0x79   : > { %1894 = vmatmul.mubr.msk.bf16.vlgmr.msra.gmra.mrb[0].mxu0 %vm408_vm1, %v384_v4  ;;  %s2163_s23 = sshll.u32 %s2265_s30, 4  ;;  %s2164_s23 = int_to_ptr.vmem [resolvable:$false] %s2163_s23 }
  0x7a   : > { %1905 = vmatprep.mubr.msk.bf16.mxu0 %vm2253_vm0, %v2252_v0  ;;  %p2166_p5 = scmp.lt.s32.totalorder %s2697_s26, %s2164_s23 }
 0x14c   : > { %v446_v6 = vpop.f32.mrb[0].mxu0 }
 0x14d   : > { %v447_v7 = vadd.f32 %v1844_v5, %v446_v6  ;;  %v1895_v8 = vpop.f32.mrb[1].mxu0 }
 0x14e   : > { %v449_v9 = vpop.f32.mrb[2].mxu0 }
 0x14f   : > { %v452_v10 = vpack.c.bf16 %v447_v7, %v447_v7  ;;  %v1896_v11 = vpop.f32.mrb[3].mxu0 }
 0x151   : > { %458 = vrot.lane.b32.xlu1 %v452_v10, %s2254_s17  ;;  %454 = vrot.lane.b32.xlu0 %v452_v10, %s2255_s21  ;;  %v466_v31 = vrot.slane %v452_v10, %v2528_v20  ;;  %s2159_s17 = scalar_lea.vmem %s2697_s26, 128  ;;  %s2165_s21 = scalar_lea.vmem %s2164_s23, 256 }
 0x152   : > { %p2160_p12 = scmp.ne.s32.totalorder %s2697_s26, %s2159_s17  ;;  %p2167_p9 = scmp.lt.s32.totalorder %s2165_s21, %s2159_s17 }
 0x154   : > { %p2161_p10 = pnand %p2160_p12, %p2775_p1  ;;  %p2168_p11 = por %p2167_p9, %p2166_p5 }
 0x155   : > { %630 = vrot.lane.b32.xlu1 %v452_v10, %s2256_s19  ;;  %456 = vrot.lane.b32.xlu0 %v452_v10, %s2257_s8 }
 0x156   : > { %p2162_p3 = pneg %p2161_p10 }
 0x158   : > { %p2169_p0 = pnand %p2168_p11, %p2162_p3 }
 0x1c3   : > { %v459_v21 = vpop.permute.xlu1 %458  ;;  %v455_v22 = vpop.permute.xlu0 %454 }
 0x1c4   : > { %v508_v23 = vrot.slane %v459_v21, %v2528_v20  ;;  %v500_v25 = vrot.slane %v455_v22, %v2528_v20  ;;  %632 = vrot.lane.b32.xlu0 %v455_v22, %s2256_s19 }
 0x1c6   : > { %v509_v26 = vcombine.low %v500_v25, %v508_v23  ;;  %v510_v27 = vcombine.high %v500_v25, %v508_v23 }
 0x1c7   : > { %v457_v28 = vpop.permute.xlu0 %456  ;;  %v631_v19 = vpop.permute.xlu1 %630 }
 0x1c8   : > { %v517_v29 = vrot.slane %v509_v26, %v2531_v24  ;;  %v474_v30 = vrot.slane %v457_v28, %v2528_v20  ;;  %636 = vrot.lane.b32.xlu0 %v459_v21, %s2256_s19  ;;  %634 = vrot.lane.b32.xlu1 %v457_v28, %s2256_s19  ;;  %v524_v32 = vrot.slane %v510_v27, %v2531_v24 }
 0x1c9   : > { %v645_v26 = vrot.slane %v631_v19, %v2528_v20 }
 0x1ca   : > { %v475_v33 = vcombine.low %v466_v31, %v474_v30  ;;  %v476_v34 = vcombine.high %v466_v31, %v474_v30  ;;  %v525_v36 = vcombine.high %v517_v29, %v2260_v35  ;;  %v526_v39 = vcombine.high %v524_v32, %v2260_v35 }
 0x1cb   : > { %v532_v40 = vshrl.u32 %v517_v29, 16  ;;  %v548_v46 = vshrl.u32 %v524_v32, 16 }
 0x1cc   : > { %810 = vrot.lane.b32.xlu0 %v455_v22, %s2261_s27  ;;  %v483_v37 = vrot.slane %v475_v33, %v2531_v24  ;;  %v490_v38 = vrot.slane %v476_v34, %v2531_v24  ;;  %808 = vrot.lane.b32.xlu1 %v452_v10, %s2261_s27  ;;  %v540_v45 = vshrl.u32 %v525_v36, 16  ;;  %v556_v53 = vshrl.u32 %v526_v39, 16 }
 0x1ce   : > { %v491_v41 = vcombine.high %v483_v37, %v2260_v35  ;;  %v492_v42 = vcombine.high %v490_v38, %v2260_v35  ;;  %v529_v43 = vpack.i.b16 %v517_v29, %v483_v37  ;;  %v531_v44 = vshrl.u32 %v483_v37, 16 }
 0x1cf   : > { %v545_v47 = vpack.i.b16 %v524_v32, %v490_v38  ;;  %v547_v48 = vshrl.u32 %v490_v38, 16 }
 0x1d0   : > { %814 = vrot.lane.b32.xlu0 %v459_v21, %s2261_s27  ;;  %v533_v49 = vpack.i.b16 %v532_v40, %v531_v44  ;;  %v537_v50 = vpack.i.b16 %v525_v36, %v491_v41  ;;  %v539_v51 = vshrl.u32 %v491_v41, 16  ;;  %v553_v52 = vpack.i.b16 %v526_v39, %v492_v42  ;;  %812 = vrot.lane.b32.xlu1 %v457_v28, %s2261_s27 }
 0x1d1   : > { %v549_v54 = vpack.i.b16 %v548_v46, %v547_v48  ;;  %v555_v55 = vshrl.u32 %v492_v42, 16  ;;  %v559_v56 = vcombine.low %v529_v43, %v545_v47 }
 0x1d2   : > { %v541_v57 = vpack.i.b16 %v540_v45, %v539_v51  ;;  %v567_v58 = vcombine.low %v537_v50, %v553_v52 }
 0x1d3   : > { %v557_v59 = vpack.i.b16 %v556_v53, %v555_v55  ;;  %v584_v60 = vcombine.low %v533_v49, %v549_v54  ;;  %v566_v61 = vrot.slane %v559_v56, %v2528_v20 }
 0x1d4   : > { %v574_v62 = vrot.slane %v567_v58, %v2528_v20 }
 0x1d5   : > { %v592_v63 = vcombine.low %v541_v57, %v557_v59  ;;  %v591_v2 = vrot.slane %v584_v60, %v2528_v20 }
 0x1d6   : > { %v575_v1 = vcombine.low %v566_v61, %v574_v62 }
 0x1d7   : > { %v599_v4 = vrot.slane %v592_v63, %v2528_v20 }
 0x1d8   : > { %v582_v5 = vrot.slane %v575_v1, %v2531_v24 }
 0x1d9   : > { %v600_v6 = vcombine.low %v591_v2, %v599_v4 }
 0x1da   : > { %v583_v7 = vcombine.high %v582_v5, %v2260_v35  ;;  %v613_v11 = vshrl.u32 %v582_v5, 16 }
 0x1db   : > { %v607_v8 = vrot.slane %v600_v6, %v2531_v24 }
 0x1dc   : > { %v621_v15 = vshrl.u32 %v583_v7, 16 }
 0x1dd   : > { %v608_v9 = vcombine.high %v607_v8, %v2260_v35  ;;  %v611_v10 = vpack.i.b16 %v607_v8, %v582_v5  ;;  %v614_v12 = vshrl.u32 %v607_v8, 16 }
 0x1df   : > { %v615_v13 = vpack.i.b16 %v614_v12, %v613_v11  ;;  %v619_v14 = vpack.i.b16 %v608_v9, %v583_v7  ;;  %v622_v16 = vshrl.u32 %v608_v9, 16  ;;  %626 = vst.msk [vmem:[#allocation2] sm:$0xf] %vm625_vm2, %v611_v10 }
 0x1e1   : > { %v623_v17 = vpack.i.b16 %v622_v16, %v621_v15  ;;  %627 = vst.msk [vmem:[#allocation2 + $0x4] sm:$0xf] %vm625_vm2, %v615_v13  ;;  %628 = vst.msk [vmem:[#allocation2 + $0x8] sm:$0xf] %vm625_vm2, %v619_v14 }
 0x1e3   : > { %629 = vst.msk [vmem:[#allocation2 + $0xc] sm:$0xf] %vm625_vm2, %v623_v17 }
 0x236   : > { %v633_v18 = vpop.permute.xlu0 %632 }
 0x237   : > { %v679_v22 = vrot.slane %v633_v18, %v2528_v20 }
 0x23a   : > { %v637_v21 = vpop.permute.xlu0 %636  ;;  %v635_v23 = vpop.permute.xlu1 %634 }
 0x23b   : > { %v687_v25 = vrot.slane %v637_v21, %v2528_v20  ;;  %v653_v27 = vrot.slane %v635_v23, %v2528_v20 }
 0x23d   : > { %v688_v28 = vcombine.low %v679_v22, %v687_v25  ;;  %v689_v29 = vcombine.high %v679_v22, %v687_v25  ;;  %v654_v30 = vcombine.low %v645_v26, %v653_v27  ;;  %v655_v31 = vcombine.high %v645_v26, %v653_v27 }
 0x23e   : > { %v811_v32 = vpop.permute.xlu0 %810  ;;  %v809_v36 = vpop.permute.xlu1 %808 }
 0x23f   : > { %v696_v33 = vrot.slane %v688_v28, %v2531_v24  ;;  %v703_v34 = vrot.slane %v689_v29, %v2531_v24  ;;  %v662_v37 = vrot.slane %v654_v30, %v2531_v24  ;;  %v669_v38 = vrot.slane %v655_v31, %v2531_v24 }
 0x240   : > { %v823_v39 = vrot.slane %v809_v36, %v2528_v20  ;;  %v857_v1 = vrot.slane %v811_v32, %v2528_v20 }
 0x241   : > { %v704_v40 = vcombine.high %v696_v33, %v2260_v35  ;;  %v705_v41 = vcombine.high %v703_v34, %v2260_v35  ;;  %v711_v42 = vshrl.u32 %v696_v33, 16  ;;  %v727_v43 = vshrl.u32 %v703_v34, 16 }
 0x242   : > { %v670_v44 = vcombine.high %v662_v37, %v2260_v35  ;;  %v671_v45 = vcombine.high %v669_v38, %v2260_v35  ;;  %v710_v46 = vshrl.u32 %v662_v37, 16  ;;  %v726_v47 = vshrl.u32 %v669_v38, 16  ;;  %v813_v52 = vpop.permute.xlu1 %812  ;;  %v815_v53 = vpop.permute.xlu0 %814 }
 0x243   : > { %v708_v48 = vpack.i.b16 %v696_v33, %v662_v37  ;;  %v719_v49 = vshrl.u32 %v704_v40, 16  ;;  %v724_v50 = vpack.i.b16 %v703_v34, %v669_v38  ;;  %v735_v51 = vshrl.u32 %v705_v41, 16 }
 0x244   : > { %v718_v54 = vshrl.u32 %v670_v44, 16  ;;  %v734_v55 = vshrl.u32 %v671_v45, 16  ;;  %v712_v56 = vpack.i.b16 %v711_v42, %v710_v46  ;;  %v716_v57 = vpack.i.b16 %v704_v40, %v670_v44 }
 0x245   : > { %v728_v58 = vpack.i.b16 %v727_v43, %v726_v47  ;;  %v732_v59 = vpack.i.b16 %v705_v41, %v671_v45  ;;  %v738_v60 = vcombine.low %v708_v48, %v724_v50  ;;  %v831_v61 = vrot.slane %v813_v52, %v2528_v20 }
 0x246   : > { %v720_v62 = vpack.i.b16 %v719_v49, %v718_v54  ;;  %v736_v63 = vpack.i.b16 %v735_v51, %v734_v55  ;;  %v865_v2 = vrot.slane %v815_v53, %v2528_v20 }
 0x247   : > { %v746_v4 = vcombine.low %v716_v57, %v732_v59  ;;  %v763_v5 = vcombine.low %v712_v56, %v728_v58  ;;  %v832_v6 = vcombine.low %v823_v39, %v831_v61  ;;  %v833_v8 = vcombine.high %v823_v39, %v831_v61 }
 0x248   : > { %v771_v7 = vcombine.low %v720_v62, %v736_v63  ;;  %v866_v9 = vcombine.low %v857_v1, %v865_v2  ;;  %v867_v10 = vcombine.high %v857_v1, %v865_v2  ;;  %v745_v11 = vrot.slane %v738_v60, %v2528_v20 }
 0x249   : > { %v753_v12 = vrot.slane %v746_v4, %v2528_v20  ;;  %v770_v13 = vrot.slane %v763_v5, %v2528_v20  ;;  %v840_v14 = vrot.slane %v832_v6, %v2531_v24  ;;  %v847_v16 = vrot.slane %v833_v8, %v2531_v24 }
 0x24a   : > { %v778_v15 = vrot.slane %v771_v7, %v2528_v20  ;;  %v874_v17 = vrot.slane %v866_v9, %v2531_v24  ;;  %v881_v18 = vrot.slane %v867_v10, %v2531_v24 }
 0x24b   : > { %v754_v19 = vcombine.low %v745_v11, %v753_v12  ;;  %v848_v21 = vcombine.high %v840_v14, %v2260_v35  ;;  %v888_v22 = vshrl.u32 %v840_v14, 16  ;;  %v849_v25 = vcombine.high %v847_v16, %v2260_v35 }
 0x24c   : > { %v779_v23 = vcombine.low %v770_v13, %v778_v15  ;;  %v904_v26 = vshrl.u32 %v847_v16, 16  ;;  %v882_v27 = vcombine.high %v874_v17, %v2260_v35  ;;  %v883_v30 = vcombine.high %v881_v18, %v2260_v35 }
 0x24d   : > { %v761_v28 = vrot.slane %v754_v19, %v2531_v24  ;;  %v896_v29 = vshrl.u32 %v848_v21, 16  ;;  %v886_v31 = vpack.i.b16 %v874_v17, %v840_v14  ;;  %v912_v33 = vshrl.u32 %v849_v25, 16 }
 0x24e   : > { %v786_v32 = vrot.slane %v779_v23, %v2531_v24  ;;  %v889_v34 = vshrl.u32 %v874_v17, 16  ;;  %v894_v36 = vpack.i.b16 %v882_v27, %v848_v21  ;;  %v897_v39 = vshrl.u32 %v882_v27, 16  ;;  %v991_v21 = vld [vmem:[#allocation2] sm:$0xf] }
 0x24f   : > { %v762_v37 = vcombine.high %v761_v28, %v2260_v35  ;;  %v792_v38 = vshrl.u32 %v761_v28, 16  ;;  %v902_v40 = vpack.i.b16 %v881_v18, %v847_v16  ;;  %v905_v47 = vshrl.u32 %v881_v18, 16 }
 0x250   : > { %v787_v41 = vcombine.high %v786_v32, %v2260_v35  ;;  %v790_v42 = vpack.i.b16 %v786_v32, %v761_v28  ;;  %v793_v43 = vshrl.u32 %v786_v32, 16  ;;  %v890_v44 = vpack.i.b16 %v889_v34, %v888_v22  ;;  %v994_v32 = vld [vmem:[#allocation2 + $0xc] sm:$0xf]  ;;  %v1848_v34 = vld [vmem:[%s377_s22] ss:$0 sm:$0xff] }
 0x251   : > { %v800_v45 = vshrl.u32 %v762_v37, 16  ;;  %v898_v46 = vpack.i.b16 %v897_v39, %v896_v29  ;;  %v910_v48 = vpack.i.b16 %v883_v30, %v849_v25  ;;  %v913_v52 = vshrl.u32 %v883_v30, 16  ;;  %v993_v29 = vld [vmem:[#allocation2 + $0x8] sm:$0xf] }
 0x252   : > { %v794_v49 = vpack.i.b16 %v793_v43, %v792_v38  ;;  %v798_v50 = vpack.i.b16 %v787_v41, %v762_v37  ;;  %v801_v51 = vshrl.u32 %v787_v41, 16  ;;  %804 = vst.msk [vmem:[#allocation3] sm:$0xf] %vm625_vm2, %v790_v42  ;;  %v906_v53 = vpack.i.b16 %v905_v47, %v904_v26  ;;  %v992_v26 = vld [vmem:[#allocation2 + $0x4] sm:$0xf] }
 0x253   : > { %v916_v54 = vcombine.low %v886_v31, %v902_v40  ;;  %v924_v55 = vcombine.low %v894_v36, %v910_v48  ;;  %v914_v57 = vpack.i.b16 %v913_v52, %v912_v33 }
 0x254   : > { %v802_v56 = vpack.i.b16 %v801_v51, %v800_v45  ;;  %805 = vst.msk [vmem:[#allocation3 + $0x4] sm:$0xf] %vm625_vm2, %v794_v49  ;;  %806 = vst.msk [vmem:[#allocation3 + $0x8] sm:$0xf] %vm625_vm2, %v798_v50  ;;  %v941_v60 = vcombine.low %v890_v44, %v906_v53 }
 0x255   : > { %v923_v58 = vrot.slane %v916_v54, %v2528_v20  ;;  %v931_v59 = vrot.slane %v924_v55, %v2528_v20  ;;  %v949_v61 = vcombine.low %v898_v46, %v914_v57 }
 0x256   : > { %807 = vst.msk [vmem:[#allocation3 + $0xc] sm:$0xf] %vm625_vm2, %v802_v56  ;;  %v948_v63 = vrot.slane %v941_v60, %v2528_v20 }
 0x257   : > { %v932_v62 = vcombine.low %v923_v58, %v931_v59  ;;  %v956_v1 = vrot.slane %v949_v61, %v2528_v20 }
 0x259   : > { %v939_v2 = vrot.slane %v932_v62, %v2531_v24  ;;  %v996_v4 = vld [vmem:[#allocation3] sm:$0xf]  ;;  %v957_v5 = vcombine.low %v948_v63, %v956_v1 }
 0x25a   : > { %v1011_v6 = vsel %vm1006_vm3, %v996_v4, 0 }
 0x25b   : > { %1898 = vmatpush3.bf16.xpose.msra.mxu1 %v1011_v6  ;;  %v997_v7 = vld [vmem:[#allocation3 + $0x4] sm:$0xf]  ;;  %v940_v8 = vcombine.high %v939_v2, %v2260_v35  ;;  %v964_v9 = vrot.slane %v957_v5, %v2531_v24  ;;  %v970_v13 = vshrl.u32 %v939_v2, 16  ;;  %v998_v15 = vld [vmem:[#allocation3 + $0x8] sm:$0xf] }
 0x25c   : > { %v1057_v10 = vsel %vm1006_vm3, %v997_v7, 0  ;;  %1909 = vmatprep.subr.bf16.mxu1 %v2252_v0  ;;  %v1103_v25 = vsel %vm1006_vm3, %v998_v15, 0 }
 0x25d   : > { %1904 = vmatpush3.bf16.xpose.msra.mxu0 %v1057_v10  ;;  %v965_v11 = vcombine.high %v964_v9, %v2260_v35  ;;  %v968_v12 = vpack.i.b16 %v964_v9, %v939_v2  ;;  %v971_v14 = vshrl.u32 %v964_v9, 16  ;;  %v978_v18 = vshrl.u32 %v940_v8, 16  ;;  %v999_v22 = vld [vmem:[#allocation3 + $0xc] sm:$0xf] }
 0x25e   : > { %1915 = vmatprep.subr.bf16.mxu0 %v2252_v0  ;;  %v1149_v27 = vsel %vm1006_vm3, %v999_v22, 0 }
 0x25f   : > { %v972_v16 = vpack.i.b16 %v971_v14, %v970_v13  ;;  %v976_v17 = vpack.i.b16 %v965_v11, %v940_v8  ;;  %v979_v19 = vshrl.u32 %v965_v11, 16  ;;  %982 = vst.msk [vmem:[#allocation4] sm:$0xf] %vm625_vm2, %v968_v12 }
 0x261   : > { %v980_v23 = vpack.i.b16 %v979_v19, %v978_v18  ;;  %983 = vst.msk [vmem:[#allocation4 + $0x4] sm:$0xf] %vm625_vm2, %v972_v16  ;;  %984 = vst.msk [vmem:[#allocation4 + $0x8] sm:$0xf] %vm625_vm2, %v976_v17 }
 0x262   : > { %1900 = vmatmul.mubr.msk.bf16.vlgmr.msra.gmra.mrb[0].mxu1 %vm1006_vm3, %v991_v21 }
 0x263   : > { %1910 = vmatpush3.bf16.xpose.msra.mxu1 %v1103_v25  ;;  %1911 = vmatprep.mubr.msk.bf16.mxu1 %vm2253_vm0, %v2252_v0  ;;  %985 = vst.msk [vmem:[#allocation4 + $0xc] sm:$0xf] %vm625_vm2, %v980_v23 }
 0x264   : > { %1906 = vmatmul.mubr.msk.bf16.vlgmr.msra.gmra.mrb[4].mxu0 %vm1006_vm3, %v992_v26  ;;  %1921 = vmatprep.subr.bf16.mxu1 %v2252_v0 }
 0x265   : > { %1916 = vmatpush3.bf16.xpose.msra.mxu0 %v1149_v27  ;;  %1917 = vmatprep.mubr.msk.bf16.mxu0 %vm2253_vm0, %v2252_v0 }
 0x266   : > { %1927 = vmatprep.subr.bf16.mxu0 %v2252_v0  ;;  %v1231_v28 = vld [vmem:[#allocation4] sm:$0xf] }
 0x267   : > { %v1240_v31 = vsel %vm1238_vm4, %v1231_v28, 0  ;;  %v2053_v28 = vld [vmem:[#allocation10] sm:$0xff]  }
 0x268   : > { %v1232_v30 = vld [vmem:[#allocation4 + $0x4] sm:$0xf]  ;;  %v1233_v11 = vld [vmem:[#allocation4 + $0x8] sm:$0xf] }
 0x269   : > { %v1286_v33 = vsel %vm1238_vm4, %v1232_v30, 0  ;;  %v1332_v16 = vsel %vm1238_vm4, %v1233_v11, 0 }
 0x26a   : > { %1912 = vmatmul.mubr.msk.bf16.vlgmr.msra.gmra.mrb[4].mxu1 %vm1006_vm3, %v993_v29  ;;  %v1234_v15 = vld [vmem:[#allocation4 + $0xc] sm:$0xf] }
 0x26b   : > { %1922 = vmatpush3.bf16.msra.mxu1 %v1240_v31  ;;  %1923 = vmatprep.mubr.msk.bf16.mxu1 %vm2253_vm0, %v2252_v0  ;;  %v1378_v19 = vsel %vm1238_vm4, %v1234_v15, 0 }
 0x26c   : > { %1918 = vmatmul.mubr.msk.bf16.vlgmr.msra.gmra.mrb[8].mxu0 %vm1006_vm3, %v994_v32  ;;  %1933 = vmatprep.subr.bf16.mxu1 %v2252_v0 }
 0x26d   : > { %1928 = vmatpush3.bf16.msra.mxu0 %v1286_v33  ;;  %1929 = vmatprep.mubr.msk.bf16.mxu0 %vm2253_vm0, %v2252_v0 }
 0x26e   : > { %1939 = vmatprep.subr.bf16.mxu0 %v2252_v0 }
 0x335   : > { %v1047_v36 = vpop.f32.mrb[0].mxu1 }
 0x336   : > { %v1048_v37 = vadd.f32 %v1848_v34, %v1047_v36  ;;  %v1901_v38 = vpop.f32.mrb[1].mxu1 }
 0x337   : > { %v1050_v39 = vpop.f32.mrb[2].mxu1  ;;  %v1093_v40 = vpop.f32.mrb[4].mxu0 }
 0x338   : > { %v1094_v41 = vadd.f32 %v1848_v34, %v1093_v40  ;;  %v1902_v42 = vpop.f32.mrb[3].mxu1  ;;  %v1907_v43 = vpop.f32.mrb[5].mxu0  ;;  %v1191_v44 = vsel %vm1006_vm3, %v1048_v37, -inf }
 0x339   : > { %1192 = vmax.xlane.f32.xlu1 %v1191_v44  ;;  %v1096_v45 = vpop.f32.mrb[6].mxu0 }
 0x33a   : > { %v1908_v46 = vpop.f32.mrb[7].mxu0  ;;  %v1194_v47 = vsel %vm1006_vm3, %v1094_v41, -inf }
 0x33b   : > { %1195 = vmax.xlane.f32.xlu0 %v1194_v47 }
 0x33d   : > { %v1139_v48 = vpop.f32.mrb[4].mxu1 }
 0x33e   : > { %v1140_v49 = vadd.f32 %v1848_v34, %v1139_v48  ;;  %v1913_v50 = vpop.f32.mrb[5].mxu1 }
 0x33f   : > { %v1142_v51 = vpop.f32.mrb[6].mxu1  ;;  %v1185_v52 = vpop.f32.mrb[8].mxu0 }
 0x340   : > { %v1186_v53 = vadd.f32 %v1848_v34, %v1185_v52  ;;  %v1914_v54 = vpop.f32.mrb[7].mxu1  ;;  %v1919_v55 = vpop.f32.mrb[9].mxu0  ;;  %v1197_v56 = vsel %vm1006_vm3, %v1140_v49, -inf }
 0x341   : > { %1198 = vmax.xlane.f32.xlu0 %v1197_v56  ;;  %v1188_v57 = vpop.f32.mrb[10].mxu0 }
 0x342   : > { %v1920_v58 = vpop.f32.mrb[11].mxu0  ;;  %v1200_v59 = vsel %vm1006_vm3, %v1186_v53, -inf }
 0x343   : > { %1201 = vmax.xlane.f32.xlu1 %v1200_v59 }
 0x3c6   : > { %v1193_v60 = vpop.xlane.xlu1 %1192 }
 0x3c7   : > { %v1203_v61 = vsub.f32 %v1048_v37, %v1193_v60 }
 0x3c8   : > { %v1196_v62 = vpop.xlane.xlu0 %1195 }
 0x3c9   : > { %v1207_v63 = vmul.f32 1.442695, %v1203_v61  ;;  %v1204_v1 = vsub.f32 %v1094_v41, %v1196_v62 }
 0x3cb   : > { %2055 = vpow2.f32 %v1207_v63  ;;  %v1209_v2 = vmul.f32 1.442695, %v1204_v1 }
 0x3cd   : > { %2057 = vpow2.f32 %v1209_v2 }
 0x3ce   : > { %v1199_v4 = vpop.xlane.xlu0 %1198 }
 0x3cf   : > { %v1205_v5 = vsub.f32 %v1140_v49, %v1199_v4 }
 0x3d0   : > { %v1202_v6 = vpop.xlane.xlu1 %1201 }
 0x3d1   : > { %v1211_v7 = vmul.f32 1.442695, %v1205_v5  ;;  %v1206_v8 = vsub.f32 %v1186_v53, %v1202_v6 }
 0x3d3   : > { %2059 = vpow2.f32 %v1211_v7  ;;  %v1213_v9 = vmul.f32 1.442695, %v1206_v8 }
 0x3d5   : > { %v2056_v10 = vpop.eup %2055  ;;  %2061 = vpow2.f32 %v1213_v9 }
 0x3d6   : > { %v1215_v12 = vsel %vm1006_vm3, %v2056_v10, 0.0  ;;  %v1227_v13 = vpack.c.bf16 %v2056_v10, %v2056_v10 }
 0x3d7   : > { %v2058_v14 = vpop.eup %2057  ;;  %1216 = vadd.xlane.f32.xlu0 %v1215_v12 }
 0x3d8   : > { %1924 = vmatmul.mubr.msk.bf16.vlgmr.msra.gmra.mrb[8].mxu1 %vm1006_vm3, %v1227_v13  ;;  %v1218_v17 = vsel %vm1006_vm3, %v2058_v14, 0.0  ;;  %v1228_v18 = vpack.c.bf16 %v2058_v14, %v2058_v14 }
 0x3d9   : > { %1934 = vmatpush3.bf16.msra.mxu1 %v1332_v16  ;;  %1219 = vadd.xlane.f32.xlu1 %v1218_v17 }
 0x3da   : > { %1930 = vmatmul.mubr.msk.bf16.vlgmr.msra.gmra.mrb[12].mxu0 %vm1006_vm3, %v1228_v18  ;;  %1935 = vmatprep.mubr.msk.bf16.mxu1 %vm2253_vm0, %v2252_v0 }
 0x3db   : > { %1940 = vmatpush3.bf16.msra.mxu0 %v1378_v19  ;;  %1941 = vmatprep.mubr.msk.bf16.mxu0 %vm2253_vm0, %v2252_v0 }
 0x3dc   : > { %1945 = vmatprep.subr.bf16.mxu1 %v2252_v0 }
 0x3dd   : > { %v2060_v21 = vpop.eup %2059 }
 0x3de   : > { %v1221_v22 = vsel %vm1006_vm3, %v2060_v21, 0.0  ;;  %v1229_v23 = vpack.c.bf16 %v2060_v21, %v2060_v21 }
 0x3df   : > { %v2062_v25 = vpop.eup %2061  ;;  %1222 = vadd.xlane.f32.xlu0 %v1221_v22 }
 0x3e0   : > { %1936 = vmatmul.mubr.msk.bf16.vlgmr.msra.gmra.mrb[12].mxu1 %vm1006_vm3, %v1229_v23  ;;  %v1224_v26 = vsel %vm1006_vm3, %v2062_v25, 0.0  ;;  %v1230_v27 = vpack.c.bf16 %v2062_v25, %v2062_v25 }
 0x3e1   : > { %1225 = vadd.xlane.f32.xlu1 %v1224_v26  ;;  %1949 = vmatprep.mubr.msk.bf16.mxu1 %vm2253_vm0, %v2252_v0 }
 0x3e2   : > { %1942 = vmatmul.mubr.msk.bf16.vlgmr.msra.gmra.mrb[16].mxu0 %vm1006_vm3, %v1230_v27  ;;  %1946 = vmatpush3.bf16.msra.mxu1 %v2053_v28 }
 0x3e3   : > { %1947 = vmatprep.subr.bf16.mxu1 %v2252_v0 }
 0x464   : > { %v1217_v29 = vpop.xlane.xlu0 %1216 }
 0x465   : > { %2063 = vrcp.f32 %v1217_v29 }
 0x466   : > { %v1220_v30 = vpop.xlane.xlu1 %1219 }
 0x467   : > { %2065 = vrcp.f32 %v1220_v30 }
 0x46c   : > { %v1223_v31 = vpop.xlane.xlu0 %1222 }
 0x46d   : > { %2067 = vrcp.f32 %v1223_v31 }
 0x46e   : > { %v1226_v32 = vpop.xlane.xlu1 %1225 }
 0x46f   : > { %2069 = vrcp.f32 %v1226_v32  ;;  %v2064_v40 = vpop.eup %2063 }
 0x471   : > { %v2066_v44 = vpop.eup %2065 }
 0x477   : > { %v2068_v45 = vpop.eup %2067 }
 0x479   : > { %v2070_v50 = vpop.eup %2069 }
 0x4ab   : > { %v1276_v33 = vpop.f32.mrb[8].mxu1 }
 0x4ac   : > { %v1925_v34 = vpop.f32.mrb[9].mxu1  ;;  %v1424_v42 = vmul.f32 %v2064_v40, %v1276_v33  ;;  %v2054_v40 = vld [vmem:[#allocation10 + $0x8] sm:$0xff]  }
 0x4ad   : > { %v1279_v36 = vpop.f32.mrb[10].mxu1  ;;  %v1322_v37 = vpop.f32.mrb[12].mxu0  ;;  %1948 = vmatpush3.bf16.msra.mxu1 %v2054_v40 }
 0x4ae   : > { %v1926_v38 = vpop.f32.mrb[11].mxu1  ;;  %v1931_v39 = vpop.f32.mrb[13].mxu0  ;;  %v1425_v0 = vmul.f32 %v2066_v44, %v1322_v37  ;;  %v1428_v47 = vpack.c.bf16 %v1424_v42, %v1424_v42 }
 0x4af   : > { %v1325_v41 = vpop.f32.mrb[14].mxu0 }
 0x4b0   : > { %v1932_v43 = vpop.f32.mrb[15].mxu0  ;;  %v1462_v53 = vpack.c.bf16 %v1425_v0, %v1425_v0  ;;  %v1435_v59 = vrot.slane %v1428_v47, %v2528_v20 }
 0x4b2   : > { %v1469_v63 = vrot.slane %v1462_v53, %v2528_v20 }
 0x4b3   : > { %v1368_v46 = vpop.f32.mrb[12].mxu1 }
 0x4b4   : > { %v1426_v48 = vmul.f32 %v2068_v45, %v1368_v46  ;;  %v1937_v49 = vpop.f32.mrb[13].mxu1 }
 0x4b5   : > { %v1371_v51 = vpop.f32.mrb[14].mxu1  ;;  %v1414_v52 = vpop.f32.mrb[16].mxu0 }
 0x4b6   : > { %v1436_v54 = vpack.c.bf16 %v1426_v48, %v1426_v48  ;;  %v1427_v55 = vmul.f32 %v2070_v50, %v1414_v52  ;;  %v1938_v56 = vpop.f32.mrb[15].mxu1  ;;  %v1943_v57 = vpop.f32.mrb[17].mxu0 }
 0x4b7   : > { %v1417_v58 = vpop.f32.mrb[18].mxu0 }
 0x4b8   : > { %v1443_v60 = vrot.slane %v1436_v54, %v2528_v20  ;;  %v1470_v61 = vpack.c.bf16 %v1427_v55, %v1427_v55  ;;  %v1944_v62 = vpop.f32.mrb[19].mxu0 }
 0x4ba   : > { %v1444_v1 = vcombine.low %v1435_v59, %v1443_v60  ;;  %v1445_v2 = vcombine.high %v1435_v59, %v1443_v60  ;;  %v1477_v4 = vrot.slane %v1470_v61, %v2528_v20  ;;  %v1857_v59 = vld [vmem:[%s2750_s5] ss:$0 sm:$0xff] }
 0x4bc   : > { %v1452_v5 = vrot.slane %v1444_v1, %v2531_v24  ;;  %v1459_v6 = vrot.slane %v1445_v2, %v2531_v24  ;;  %v1478_v7 = vcombine.low %v1469_v63, %v1477_v4  ;;  %v1479_v8 = vcombine.high %v1469_v63, %v1477_v4 }
 0x4be   : > { %v1460_v9 = vcombine.high %v1452_v5, %v2260_v35  ;;  %v1486_v10 = vrot.slane %v1478_v7, %v2531_v24  ;;  %v1493_v11 = vrot.slane %v1479_v8, %v2531_v24  ;;  %v1461_v12 = vcombine.high %v1459_v6, %v2260_v35 }
 0x4bf   : > { %v1500_v13 = vshrl.u32 %v1452_v5, 16  ;;  %v1516_v19 = vshrl.u32 %v1459_v6, 16 }
 0x4c0   : > { %v1494_v14 = vcombine.high %v1486_v10, %v2260_v35  ;;  %v1495_v15 = vcombine.high %v1493_v11, %v2260_v35  ;;  %v1498_v16 = vpack.i.b16 %v1486_v10, %v1452_v5  ;;  %v1501_v17 = vshrl.u32 %v1486_v10, 16 }
 0x4c1   : > { %v1508_v18 = vshrl.u32 %v1460_v9, 16  ;;  %v1514_v21 = vpack.i.b16 %v1493_v11, %v1459_v6  ;;  %v1517_v22 = vshrl.u32 %v1493_v11, 16  ;;  %v1524_v28 = vshrl.u32 %v1461_v12, 16 }
 0x4c2   : > { %v1502_v23 = vpack.i.b16 %v1501_v17, %v1500_v13  ;;  %v1506_v25 = vpack.i.b16 %v1494_v14, %v1460_v9  ;;  %v1509_v26 = vshrl.u32 %v1494_v14, 16  ;;  %v1522_v27 = vpack.i.b16 %v1495_v15, %v1461_v12 }
 0x4c3   : > { %v1518_v29 = vpack.i.b16 %v1517_v22, %v1516_v19  ;;  %v1525_v30 = vshrl.u32 %v1495_v15, 16  ;;  %v1528_v31 = vcombine.low %v1498_v16, %v1514_v21  ;;  %v1862_v15 = vld [vmem:[%s2752_s7] ss:$0 sm:$0xff] }
 0x4c4   : > { %v1510_v32 = vpack.i.b16 %v1509_v26, %v1508_v18  ;;  %v1536_v33 = vcombine.low %v1506_v25, %v1522_v27 }
 0x4c5   : > { %v1526_v34 = vpack.i.b16 %v1525_v30, %v1524_v28  ;;  %v1553_v36 = vcombine.low %v1502_v23, %v1518_v29  ;;  %v1535_v37 = vrot.slane %v1528_v31, %v2528_v20 }
 0x4c6   : > { %v1543_v38 = vrot.slane %v1536_v33, %v2528_v20 }
 0x4c7   : > { %v1561_v39 = vcombine.low %v1510_v32, %v1526_v34  ;;  %v1560_v42 = vrot.slane %v1553_v36, %v2528_v20 }
 0x4c8   : > { %v1544_v41 = vcombine.low %v1535_v37, %v1543_v38 }
 0x4c9   : > { %v1568_v43 = vrot.slane %v1561_v39, %v2528_v20 }
 0x4ca   : > { %v1551_v44 = vrot.slane %v1544_v41, %v2531_v24 }
 0x4cb   : > { %v1569_v0 = vcombine.low %v1560_v42, %v1568_v43 }
 0x4cc   : > { %v1552_v46 = vcombine.high %v1551_v44, %v2260_v35  ;;  %v1581_v47 = vshrl.u32 %v1551_v44, 16 }
 0x4cd   : > { %v1576_v45 = vrot.slane %v1569_v0, %v2531_v24 }
 0x4ce   : > { %v1587_v53 = vshrl.u32 %v1552_v46, 16 }
 0x4cf   : > { %v1582_v48 = vshrl.u32 %v1576_v45, 16  ;;  %v1577_v49 = vcombine.high %v1576_v45, %v2260_v35  ;;  %v1580_v50 = vpack.i.b16 %v1576_v45, %v1551_v44 }
 0x4d1   : > { %v1583_v51 = vpack.i.b16 %v1582_v48, %v1581_v47  ;;  %v1586_v52 = vpack.i.b16 %v1577_v49, %v1552_v46  ;;  %v1588_v54 = vshrl.u32 %v1577_v49, 16 }
 0x4d3   : > { %1590 = vrot.lane.b32.xlu0 %v1583_v51, %s2262_s12  ;;  %1592 = vrot.lane.b32.xlu1 %v1586_v52, %s2263_s18  ;;  %v1589_v20 = vpack.i.b16 %v1588_v54, %v1587_v53  ;;  %s2774_s18 = sld [smem:[#allocation17_spill]] }
 0x4d7   : > { %1594 = vrot.lane.b32.xlu1 %v1589_v20, %s2264_s13 }
 0x4d9   : > { %s2695_s13 = scalar_lea.hbm %s2774_s18, %s1864_s11 }
 0x545   : > { %v1591_v55 = vpop.permute.xlu0 %1590  ;;  %v1593_v24 = vpop.permute.xlu1 %1592 }
 0x546   : > { %v1598_v56 = vsel %vm1006_vm3, %v1580_v50, %v1591_v55 }
 0x547   : > { %v1601_v57 = vsel %vm1599_vm5, %v1598_v56, %v1593_v24 }
 0x549   : > { %v1595_v35 = vpop.permute.xlu1 %1594 }
 0x54a   : > { %v1604_v58 = vsel %vm1602_vm6, %v1601_v57, %v1595_v35 }
 0x54b   : > { %1950 = vmatmul.mubr.msk.bf16.vlgmr.msra.gmra.mrb[16].mxu1 %vm408_vm1, %v1604_v58 }
 0x61e   : > { %v1665_v60 = vpop.f32.mrb[16].mxu1 }
 0x61f   : > { %v1666_v61 = vadd.f32 %v1857_v59, %v1665_v60  ;;  %v1951_v62 = vpop.f32.mrb[17].mxu1 }
 0x620   : > { %v1668_v63 = vpop.f32.mrb[18].mxu1 }
 0x621   : > { %v1952_v1 = vpop.f32.mrb[19].mxu1  ;;  %v1673_v2 = vadd.f32 %v1666_v61, %v2516_v3  ;;  %v1861_v3 = vld [vmem:[%s2751_s6] ss:$0 sm:$0xff] }
 0x623   : > { %v1674_v4 = vsel %vm408_vm1, %v1673_v2, 0.0 }
 0x624   : > { %1675 = vadd.xlane.f32.xlu0 %v1674_v4 }
 0x6b1   : > { %v1676_v5 = vpop.xlane.xlu0 %1675 }
 0x6b2   : > { %v1678_v6 = vmul.f32 0.03125, %v1676_v5 }
 0x6b4   : > { %v1679_v7 = vsub.f32 %v1673_v2, %v1678_v6 }
 0x6b6   : > { %v1680_v8 = vmul.f32 %v1679_v7, %v1679_v7 }
 0x6b8   : > { %v1681_v9 = vsel %vm408_vm1, %v1680_v8, 0.0 }
 0x6b9   : > { %1682 = vadd.xlane.f32.xlu1 %v1681_v9 }
 0x746   : > { %v1683_v10 = vpop.xlane.xlu1 %1682 }
 0x747   : > { %v1684_v11 = vmul.f32 0.03125, %v1683_v10 }
 0x749   : > { %v1685_v12 = vadd.f32 1e-12, %v1684_v11 }
 0x74b   : > { %2071 = vrsqrt.f32 %v1685_v12 }
 0x755   : > { %v2072_v13 = vpop.eup %2071 }
 0x756   : > { %v1687_v14 = vmul.f32 %v2072_v13, %v1679_v7 }
 0x758   : > { %v1695_v16 = vmul.f32 %v1861_v3, %v1687_v14 }
 0x75a   : > { %v1703_v17 = vadd.f32 %v1862_v15, %v1695_v16 }
 0x75c   : > { %1704 = vst.msk [vmem:[%s374_s14] sm:$0xff] %vm408_vm1, %v1703_v17 }
 0x75d   : > { %2172 = shalt.err (!%p2169_p0)
}
 0x75e   : > { %s2173_s25 = scalar_lea.hbm %s2695_s13, 128  ;;  %s2177_s27 = scalar_lea.hbm %s2774_s18, 256 }
 0x75f   : > { %p2174_p4 = scmp.ne.s32.totalorder %s2695_s13, %s2173_s25  ;;  %p2178_p7 = scmp.lt.u32.totalorder %s2695_s13, %s2774_s18 }
 0x760   : > { %p2179_p2 = scmp.lt.u32.totalorder %s2177_s27, %s2173_s25  ;;  %p2181_p12 = scmp.lt.u32.totalorder %s2173_s25, %s2695_s13 }
 0x761   : > { %p2175_p13 = pnand %p2174_p4, %p2775_p1 }
 0x762   : > { %p2180_p8 = por %p2179_p2, %p2178_p7 }
 0x763   : > { %p2176_p6 = pneg %p2175_p13 }
 0x764   : > { %p2182_p10 = por %p2181_p12, %p2180_p8 }
 0x766   : > { %p2183_p3 = pnand %p2182_p10, %p2176_p6 }
 0x768   : > { %2186 = shalt.err (!%p2183_p3)
}
 0x769   : > { %1963 = dma.vmem_to_hbm [thread:$0]  (%p2775_p1), %s2697_s26, 128, %s2695_s13, %s1706_s15  }
 0x76a PF: > { %s2776_s22 = sld [smem:[#allocation15_spill]]  ;;  %s2777_s12 = sld [smem:[#allocation16_spill]] }
 0x76b   : > { %p2779_p9 = scmp.ge.s32.totalorder %s2245_s10, 2 }
 0x770   : > { %s1732_s17 = sand.u32 1, %s2776_s22   ;;  %p2778_p5 = scmp.ne.s32.totalorder %s2777_s12, 0 }
 0x771   : > { %s1733_s30 = scalar_lea.sflag [#allocation7], %s1732_s17 }
 0x772   : > { %p1977_p11 = pnand %p2779_p9, %p2778_p5 }
 0x774   : > { %2220 = dma.done.wait (!%p1977_p11), %s1733_s30, 128  }
 0x775   : > { %2222 = vsyncadd (!%p1977_p11), %s1733_s30, 4294967168  ;;  %s25_s10 = sadd.s32 1, %s2245_s10   ;;  %s2780_s27 = smov %s2229_s28 }
 0x776   : > { %p22_p0 = scmp.ge.s32.totalorder %s25_s10, 4   ;;  %s2781_s28 = smov %s2233_s29 }
 0x777   : > { %s2782_s29 = smov %s2453_s24  ;;  %s2783_s30 = smov %s2241_s9 }
 0x778   : > { %s2784_s9 = smov %s2786_s16  ;;  %24 = sbr.rel (!%p22_p0) target bundleno = 9 (0x9), region = 114 }
 0x77f   :  { %1738 = vsyncpa [#allocation6], 1 }
 0x780   :  { %1740 = vsyncpa [#allocation6 + $0x1], 1 }
 0x781   :  { %1741 = vsyncpa [#allocation9], 1 }
 0x782   :  { %1742 = vsyncpa [#allocation7], 1 }
 0x783   :  { %1744 = vsyncpa [#allocation7 + $0x1], 1 }

</bundles_post_ra>
